<compile_context>
chip_gen: v7x
topology: tpu7x:2x2x1
jax: 0.10.0
libtpu: 0.0.40
codegen_flags: <defaults>
</compile_context>

<pallas_src>
import functools

import jax
import jax.numpy as jnp
from jax.experimental import pallas as pl
from jax.experimental.pallas import tpu as pltpu

_LANE = 128  # TPU lane width; batch tiles are multiples of this.


def _mlp_kernel(xT_ref,
                w1_ref, b1_ref,
                w2_ref, b2_ref,
                w3_ref, b3_ref,
                w4_ref, b4_ref,
                o_ref, *, matmul_dtype):
    """One batch tile of the 4-layer MLP in [features, batch_tile] layout."""

    def dense(h, w_ref, b_ref):
        # MXU matmul: [out, in] @ [in, batch_tile] -> [out, batch_tile], f32 acc.
        w = w_ref[...].astype(matmul_dtype)
        h = h.astype(matmul_dtype)
        return jnp.dot(w, h, preferred_element_type=jnp.float32) + b_ref[...]

    h = xT_ref[...].astype(jnp.float32)
    h = jnp.tanh(dense(h, w1_ref, b1_ref))
    h = jnp.tanh(dense(h, w2_ref, b2_ref))
    h = jnp.tanh(dense(h, w3_ref, b3_ref))
    y = dense(h, w4_ref, b4_ref)
    o_ref[...] = y.astype(o_ref.dtype)


def _round_up(n, m):
    return ((n + m - 1) // m) * m


@functools.partial(jax.jit, static_argnames=("block_batch", "matmul_dtype"))
def nn_ansatz_forward(x, params, *, block_batch=512, matmul_dtype=jnp.float32):
    """Forward pass of NNAnsatz.

    x      : [batch, input_dim] float32
    params : (w1, b1, w2, b2, w3, b3, w4, b4) with w_k shaped
             (out_k, in_k) (PyTorch layout) and b_k shaped (out_k, 1).
    returns: [batch, output_dim] float32
    """
    w1, b1, w2, b2, w3, b3, w4, b4 = params
    batch, input_dim = x.shape
    hidden_dim = w1.shape[0]
    output_dim = w4.shape[0]

    # Batch tile: a multiple of the 128-lane width, no bigger than needed.
    tile = max(_LANE, (int(block_batch) // _LANE) * _LANE)
    tile = min(tile, _round_up(batch, _LANE))
    padded = _round_up(batch, tile)
    grid = (padded // tile,)

    # Lane-dense transposed input: [input_dim, padded_batch], zero padded.
    xT = jnp.pad(x.T, ((0, 0), (0, padded - batch)))

    def const_spec(shape):
        # Full (tiny) weight/bias tile, same block index for every grid step,
        # so the pipeline keeps it resident in VMEM.
        return pl.BlockSpec(shape, lambda i: (0, 0))

    kernel = functools.partial(_mlp_kernel, matmul_dtype=matmul_dtype)

    yT = pl.pallas_call(
        kernel,
        out_shape=jax.ShapeDtypeStruct((output_dim, padded), x.dtype),
        grid_spec=pltpu.PrefetchScalarGridSpec(
            num_scalar_prefetch=0,
            grid=grid,
            in_specs=[
                pl.BlockSpec((input_dim, tile), lambda i: (0, i)),
                const_spec((hidden_dim, input_dim)),
                const_spec((hidden_dim, 1)),
                const_spec((hidden_dim, hidden_dim)),
                const_spec((hidden_dim, 1)),
                const_spec((hidden_dim, hidden_dim)),
                const_spec((hidden_dim, 1)),
                const_spec((output_dim, hidden_dim)),
                const_spec((output_dim, 1)),
            ],
            out_specs=pl.BlockSpec((output_dim, tile), lambda i: (0, i)),
        ),
        compiler_params=pltpu.CompilerParams(
            dimension_semantics=("parallel",)),
    )(xT, w1, b1, w2, b2, w3, b3, w4, b4)

    # Back to PyTorch's [batch, output_dim] orientation; drop batch padding.
    return yT.T[:batch]


def init_params(key, input_dim, hidden_dim, output_dim):
    """Deterministic init, PyTorch Linear-style bounds, (out, in) weight layout."""
    dims = [(input_dim, hidden_dim),
            (hidden_dim, hidden_dim),
            (hidden_dim, hidden_dim),
            (hidden_dim, output_dim)]
    params = []
    for fan_in, fan_out in dims:
        key, kw, kb = jax.random.split(key, 3)
        bound = 1.0 / jnp.sqrt(fan_in)
        w = jax.random.uniform(kw, (fan_out, fan_in), jnp.float32, -bound, bound)
        b = jax.random.uniform(kb, (fan_out, 1), jnp.float32, -bound, bound)
        params.extend([w, b])
    return tuple(params)


def reference_forward(x, params):
    """Plain-XLA reference: y = x @ W.T + b (PyTorch Linear semantics)."""
    w1, b1, w2, b2, w3, b3, w4, b4 = params
    h = jnp.tanh(x @ w1.T + b1.T)
    h = jnp.tanh(h @ w2.T + b2.T)
    h = jnp.tanh(h @ w3.T + b3.T)
    return h @ w4.T + b4.T


if __name__ == "__main__":
    # PINN-ansatz shapes: (t, x) inputs -> scalar temperature field.
    input_dim, hidden_dim, output_dim = 2, 32, 1

    key = jax.random.PRNGKey(0)
    key, kparam = jax.random.split(key)
    params = init_params(kparam, input_dim, hidden_dim, output_dim)

    # 1) Small batch (single padded 128-wide tile, grid of 1).
    key, kx = jax.random.split(key)
    x_small = jax.random.normal(kx, (16, input_dim), jnp.float32)
    out = jax.block_until_ready(nn_ansatz_forward(x_small, params))
    ref = reference_forward(x_small, params)
    assert out.shape == (16, output_dim)
    assert jnp.allclose(out, ref, atol=1e-4, rtol=1e-4), "f32 mismatch vs reference"

    # 2) Multi-step grid + batch padding path (300 rows -> 3 tiles of 128).
    key, kx2 = jax.random.split(key)
    x_multi = jax.random.normal(kx2, (300, input_dim), jnp.float32)
    out_multi = jax.block_until_ready(
        nn_ansatz_forward(x_multi, params, block_batch=128))
    ref_multi = reference_forward(x_multi, params)
    assert out_multi.shape == (300, output_dim)
    assert jnp.allclose(out_multi, ref_multi, atol=1e-4, rtol=1e-4), \
        "f32 multi-tile mismatch vs reference"

    # 3) bf16 MXU-operand path (v6e/v7x recommendation); f32 accumulation,
    #    so only a precision tradeoff -> loose tolerance.
    out_bf16 = jax.block_until_ready(
        nn_ansatz_forward(x_multi, params, block_batch=128,
                          matmul_dtype=jnp.bfloat16))
    assert jnp.allclose(out_bf16, ref_multi, atol=1e-1, rtol=1e-1), \
        "bf16 mismatch vs reference"

    print("KERNEL_OK")
</pallas_src>

<mosaic_0001>
module attributes {stable_mosaic.version = 11 : i64} {
  func.func @_mlp_kernel(%arg0: i32, %arg1: memref<2x128xf32, #tpu.memory_space<vmem>>, %arg2: memref<32x2xf32, #tpu.memory_space<vmem>>, %arg3: memref<32x1xf32, #tpu.memory_space<vmem>>, %arg4: memref<32x32xf32, #tpu.memory_space<vmem>>, %arg5: memref<32x1xf32, #tpu.memory_space<vmem>>, %arg6: memref<32x32xf32, #tpu.memory_space<vmem>>, %arg7: memref<32x1xf32, #tpu.memory_space<vmem>>, %arg8: memref<1x32xf32, #tpu.memory_space<vmem>>, %arg9: memref<1x1xf32, #tpu.memory_space<vmem>>, %arg10: memref<1x128xf32, #tpu.memory_space<vmem>>) attributes {dimension_semantics = [#tpu.dimension_semantics<parallel>], iteration_bounds = array<i64: 1>, scalar_prefetch = 0 : i64, scratch_operands = 0 : i64, tpu.core_type = #tpu.core_type<tc>, window_params = [{transform_indices = @transform_0, window_bounds = array<i64: 2, 128>}, {pipeline_mode = #tpu.pipeline_mode<synchronous>, transform_indices = @transform_1, window_bounds = array<i64: 32, 2>}, {pipeline_mode = #tpu.pipeline_mode<synchronous>, transform_indices = @transform_2, window_bounds = array<i64: 32, 1>}, {pipeline_mode = #tpu.pipeline_mode<synchronous>, transform_indices = @transform_3, window_bounds = array<i64: 32, 32>}, {pipeline_mode = #tpu.pipeline_mode<synchronous>, transform_indices = @transform_4, window_bounds = array<i64: 32, 1>}, {pipeline_mode = #tpu.pipeline_mode<synchronous>, transform_indices = @transform_5, window_bounds = array<i64: 32, 32>}, {pipeline_mode = #tpu.pipeline_mode<synchronous>, transform_indices = @transform_6, window_bounds = array<i64: 32, 1>}, {pipeline_mode = #tpu.pipeline_mode<synchronous>, transform_indices = @transform_7, window_bounds = array<i64: 1, 32>}, {pipeline_mode = #tpu.pipeline_mode<synchronous>, transform_indices = @transform_8, window_bounds = array<i64: 1, 1>}, {transform_indices = @transform_9, window_bounds = array<i64: 1, 128>}]} {
    %c0 = arith.constant 0 : index
    %c0_0 = arith.constant 0 : index
    %0 = vector.load %arg1[%c0, %c0_0] : memref<2x128xf32, #tpu.memory_space<vmem>>, vector<2x128xf32>
    %c0_1 = arith.constant 0 : index
    %c0_2 = arith.constant 0 : index
    %1 = vector.load %arg2[%c0_1, %c0_2] : memref<32x2xf32, #tpu.memory_space<vmem>>, vector<32x2xf32>
    %cst = arith.constant dense<0.000000e+00> : vector<32x128xf32>
    %2 = tpu.matmul %1, %0, %cst {dimension_numbers = #tpu.dot_dimension_numbers<[1], [0], [0], [1], [0, 0, 1, 1], [], []>} : vector<32x2xf32>, vector<2x128xf32>, vector<32x128xf32> -> vector<32x128xf32>
    %c0_3 = arith.constant 0 : index
    %c0_4 = arith.constant 0 : index
    %3 = vector.load %arg3[%c0_3, %c0_4] : memref<32x1xf32, #tpu.memory_space<vmem>>, vector<32x1xf32>
    %4 = vector.broadcast %3 : vector<32x1xf32> to vector<32x128xf32>
    %5 = arith.addf %2, %4 : vector<32x128xf32>
    %6 = math.tanh %5 : vector<32x128xf32>
    %c0_5 = arith.constant 0 : index
    %c0_6 = arith.constant 0 : index
    %7 = vector.load %arg4[%c0_5, %c0_6] : memref<32x32xf32, #tpu.memory_space<vmem>>, vector<32x32xf32>
    %cst_7 = arith.constant dense<0.000000e+00> : vector<32x128xf32>
    %8 = tpu.matmul %7, %6, %cst_7 {dimension_numbers = #tpu.dot_dimension_numbers<[1], [0], [0], [1], [0, 0, 1, 1], [], []>} : vector<32x32xf32>, vector<32x128xf32>, vector<32x128xf32> -> vector<32x128xf32>
    %c0_8 = arith.constant 0 : index
    %c0_9 = arith.constant 0 : index
    %9 = vector.load %arg5[%c0_8, %c0_9] : memref<32x1xf32, #tpu.memory_space<vmem>>, vector<32x1xf32>
    %10 = vector.broadcast %9 : vector<32x1xf32> to vector<32x128xf32>
    %11 = arith.addf %8, %10 : vector<32x128xf32>
    %12 = math.tanh %11 : vector<32x128xf32>
    %c0_10 = arith.constant 0 : index
    %c0_11 = arith.constant 0 : index
    %13 = vector.load %arg6[%c0_10, %c0_11] : memref<32x32xf32, #tpu.memory_space<vmem>>, vector<32x32xf32>
    %cst_12 = arith.constant dense<0.000000e+00> : vector<32x128xf32>
    %14 = tpu.matmul %13, %12, %cst_12 {dimension_numbers = #tpu.dot_dimension_numbers<[1], [0], [0], [1], [0, 0, 1, 1], [], []>} : vector<32x32xf32>, vector<32x128xf32>, vector<32x128xf32> -> vector<32x128xf32>
    %c0_13 = arith.constant 0 : index
    %c0_14 = arith.constant 0 : index
    %15 = vector.load %arg7[%c0_13, %c0_14] : memref<32x1xf32, #tpu.memory_space<vmem>>, vector<32x1xf32>
    %16 = vector.broadcast %15 : vector<32x1xf32> to vector<32x128xf32>
    %17 = arith.addf %14, %16 : vector<32x128xf32>
    %18 = math.tanh %17 : vector<32x128xf32>
    %c0_15 = arith.constant 0 : index
    %c0_16 = arith.constant 0 : index
    %19 = vector.load %arg8[%c0_15, %c0_16] : memref<1x32xf32, #tpu.memory_space<vmem>>, vector<1x32xf32>
    %cst_17 = arith.constant dense<0.000000e+00> : vector<1x128xf32>
    %20 = tpu.matmul %19, %18, %cst_17 {dimension_numbers = #tpu.dot_dimension_numbers<[1], [0], [0], [1], [0, 0, 1, 1], [], []>} : vector<1x32xf32>, vector<32x128xf32>, vector<1x128xf32> -> vector<1x128xf32>
    %c0_18 = arith.constant 0 : index
    %c0_19 = arith.constant 0 : index
    %21 = vector.load %arg9[%c0_18, %c0_19] : memref<1x1xf32, #tpu.memory_space<vmem>>, vector<1x1xf32>
    %22 = vector.broadcast %21 : vector<1x1xf32> to vector<1x128xf32>
    %23 = arith.addf %20, %22 : vector<1x128xf32>
    %c0_20 = arith.constant 0 : index
    %c0_21 = arith.constant 0 : index
    %24 = vector.load %arg10[%c0_20, %c0_21] : memref<1x128xf32, #tpu.memory_space<vmem>>, vector<1x128xf32>
    tpu.vector_store %arg10[%c0_20, %c0_21], %23 {strides = array<i32>} : memref<1x128xf32, #tpu.memory_space<vmem>>, vector<1x128xf32>,
    return
  }
  func.func @transform_0(%arg0: i32) -> (i32, i32) {
    %c0_i32 = arith.constant 0 : i32
    %c0_i32_0 = arith.constant 0 : i32
    return %c0_i32, %arg0 : i32, i32
  }
  func.func @transform_1(%arg0: i32) -> (i32, i32) {
    %c0_i32 = arith.constant 0 : i32
    %c0_i32_0 = arith.constant 0 : i32
    %c0_i32_1 = arith.constant 0 : i32
    return %c0_i32, %c0_i32_0 : i32, i32
  }
  func.func @transform_2(%arg0: i32) -> (i32, i32) {
    %c0_i32 = arith.constant 0 : i32
    %c0_i32_0 = arith.constant 0 : i32
    %c0_i32_1 = arith.constant 0 : i32
    return %c0_i32, %c0_i32_0 : i32, i32
  }
  func.func @transform_3(%arg0: i32) -> (i32, i32) {
    %c0_i32 = arith.constant 0 : i32
    %c0_i32_0 = arith.constant 0 : i32
    %c0_i32_1 = arith.constant 0 : i32
    return %c0_i32, %c0_i32_0 : i32, i32
  }
  func.func @transform_4(%arg0: i32) -> (i32, i32) {
    %c0_i32 = arith.constant 0 : i32
    %c0_i32_0 = arith.constant 0 : i32
    %c0_i32_1 = arith.constant 0 : i32
    return %c0_i32, %c0_i32_0 : i32, i32
  }
  func.func @transform_5(%arg0: i32) -> (i32, i32) {
    %c0_i32 = arith.constant 0 : i32
    %c0_i32_0 = arith.constant 0 : i32
    %c0_i32_1 = arith.constant 0 : i32
    return %c0_i32, %c0_i32_0 : i32, i32
  }
  func.func @transform_6(%arg0: i32) -> (i32, i32) {
    %c0_i32 = arith.constant 0 : i32
    %c0_i32_0 = arith.constant 0 : i32
    %c0_i32_1 = arith.constant 0 : i32
    return %c0_i32, %c0_i32_0 : i32, i32
  }
  func.func @transform_7(%arg0: i32) -> (i32, i32) {
    %c0_i32 = arith.constant 0 : i32
    %c0_i32_0 = arith.constant 0 : i32
    %c0_i32_1 = arith.constant 0 : i32
    return %c0_i32, %c0_i32_0 : i32, i32
  }
  func.func @transform_8(%arg0: i32) -> (i32, i32) {
    %c0_i32 = arith.constant 0 : i32
    %c0_i32_0 = arith.constant 0 : i32
    %c0_i32_1 = arith.constant 0 : i32
    return %c0_i32, %c0_i32_0 : i32, i32
  }
  func.func @transform_9(%arg0: i32) -> (i32, i32) {
    %c0_i32 = arith.constant 0 : i32
    %c0_i32_0 = arith.constant 0 : i32
    return %c0_i32, %arg0 : i32, i32
  }
}

</mosaic_0001>

<bundles_post_ra>
// kernel: nn_ansatz_forward.1
= control target key start
LH: loop header
LB: loop body
LE: loop exit
PB: predicated region body
PF: predicated region fallthrough
CT: control target
= control target key end

     0   :  { %vm76_vm0 = vcmask 1041408   ;;  %vm63_vm1 = vcmask 15360   ;;  %v656_v3 = vmov 0   ;;  %vm197_vm2 = vcmask 261120   ;;  %s809_s0 = inlined_call_operand.vmem [shape: f32[2,128], index: 0, kind: input, shape index: {}]   ;;  %s810_s1 = inlined_call_operand.vmem [shape: f32[32,2], index: 1, kind: input, shape index: {}]   ;;  %s811_s2 = inlined_call_operand.vmem [shape: f32[32,1], index: 2, kind: input, shape index: {}]   ;;  %s812_s8 = inlined_call_operand.<no memory space> [shape: f32[1,1], index: 8, kind: input, shape index: {}]   ;;  %s813_s4 = inlined_call_operand.vmem [shape: f32[32,1], index: 4, kind: input, shape index: {}]   ;;  %s814_s6 = inlined_call_operand.vmem [shape: f32[32,1], index: 6, kind: input, shape index: {}]   ;;  %s815_s3 = inlined_call_operand.vmem [shape: f32[32,32], index: 3, kind: input, shape index: {}]   ;;  %s816_s5 = inlined_call_operand.vmem [shape: f32[32,32], index: 5, kind: input, shape index: {}]   ;;  %s817_s7 = inlined_call_operand.vmem [shape: f32[1,32], index: 7, kind: input, shape index: {}]   ;;  %s818_s9 = inlined_call_operand.vmem [shape: f32[1,128], index: 9, kind: output, shape index: {}]  }
   0x1   :  { %v34_v0 = vld [vmem:[%s809_s0] sm:$0x3]  ;;  %v36_v2 = vld [vmem:[%s810_s1 + $0x8] sm:$0xff]  ;;  %630 = vset.pattern.permute.xlu0 %v656_v3  ;;  %631 = vset.pattern.permute.xlu1 %v656_v3  ;;  %v14_v4 = vstv %s812_s8  ;;  %v37_v5 = vld [vmem:[%s810_s1 + $0x10] sm:$0xff]  ;;  %vm658_vm3 = vmmov 0  }
   0x2   :  { %v35_v1 = vld [vmem:[%s810_s1] sm:$0xff]  ;;  %557 = vmatprep.subr.msk.mxu0 %vm76_vm0, %v34_v0  ;;  %15 = vst [vmem:[#allocation2] sm:$0x1] %v14_v4  ;;  %v41_v7 = vld [vmem:[%s811_s2 + $0x10] sm:$0xff]  ;;  %v40_v8 = vld [vmem:[%s811_s2 + $0x8] sm:$0xff] }
   0x3   :  { %559 = vmatprep.mubr.msk.f32.mxu0 %vm63_vm1, %v35_v1  ;;  %v39_v6 = vld [vmem:[%s811_s2] sm:$0xff]  ;;  %558 = vmatpush3.msk.msra.mxu0 %vm76_vm0, %v34_v0  ;;  %v38_v9 = vld [vmem:[%s810_s1 + $0x18] sm:$0xff]  ;;  %v174_v12 = vld [vmem:[%s813_s4 + $0x8] sm:$0xff]  ;;  %v657_v0 = vmov 0.0|0.0   ;;  %v659_v1 = vmov 0.0  }
   0x4   :  { %45 = vperm.xlu0 %630, %v39_v6   ;;  %560 = vmatmul.mubr.msk.f32.vlgmr.msra.gmra.mrb[0].mxu0 %vm63_vm1, %v36_v2  ;;  %v42_v10 = vld [vmem:[%s811_s2 + $0x18] sm:$0xff]  ;;  %v173_v11 = vld [vmem:[%s813_s4] sm:$0xff]  ;;  %v175_v13 = vld [vmem:[%s813_s4 + $0x10] sm:$0xff] }
   0x5   :  { %55 = vperm.xlu1 %631, %v41_v7   ;;  %562 = vmatprep.mubr.msk.f32.mxu0 %vm63_vm1, %v37_v5  ;;  %v176_v14 = vld [vmem:[%s813_s4 + $0x18] sm:$0xff]  ;;  %v303_v15 = vld [vmem:[%s814_s6] sm:$0xff]  ;;  %v304_v16 = vld [vmem:[%s814_s6 + $0x8] sm:$0xff] }
   0x6   :  { %v305_v17 = vld [vmem:[%s814_s6 + $0x10] sm:$0xff]  ;;  %v306_v18 = vld [vmem:[%s814_s6 + $0x18] sm:$0xff]  ;;  %v169_v20 = vld [vmem:[%s815_s3] sm:$0xff] }
   0x7   :  { %573 = vmatprep.mubr.msk.f32.mxu1 %vm197_vm2, %v169_v20  ;;  %v170_v39 = vld [vmem:[%s815_s3 + $0x8] sm:$0xff]  ;;  %v171_v40 = vld [vmem:[%s815_s3 + $0x10] sm:$0xff]  ;;  %v172_v41 = vld [vmem:[%s815_s3 + $0x18] sm:$0xff] }
   0x8   :  { %50 = vperm.xlu0 %630, %v40_v8   ;;  %563 = vmatmul.mubr.msk.f32.gmra.mrb[2].mxu0 %vm63_vm1, %v38_v9  ;;  %v299_v42 = vld [vmem:[%s816_s5] sm:$0xff]  ;;  %v300_v61 = vld [vmem:[%s816_s5 + $0x8] sm:$0xff]  ;;  %v301_v62 = vld [vmem:[%s816_s5 + $0x10] sm:$0xff] }
   0x9   :  { %60 = vperm.xlu1 %631, %v42_v10   ;;  %v429_v19 = vld [vmem:[#allocation2] sm:$0x1]  ;;  %587 = vmatprep.mubr.msk.f32.mxu0 %vm197_vm2, %v299_v42  ;;  %v302_v63 = vld [vmem:[%s816_s5 + $0x18] sm:$0xff] }
   0xa   :  { %v428_v20 = vld [vmem:[%s817_s7] sm:$0x1] }
   0xc   :  { %179 = vperm.xlu0 %630, %v173_v11  }
   0xd   :  { %184 = vperm.xlu1 %631, %v174_v12  }
  0x10   :  { %189 = vperm.xlu0 %630, %v175_v13  }
  0x11   :  { %194 = vperm.xlu1 %631, %v176_v14  }
  0x14   :  { %309 = vperm.xlu0 %630, %v303_v15  }
  0x15   :  { %314 = vperm.xlu1 %631, %v304_v16  }
  0x18   :  { %319 = vperm.xlu0 %630, %v305_v17  }
  0x19   :  { %324 = vperm.xlu1 %631, %v306_v18  }
  0x1c   :  { %432 = vperm.xlu0 %630, %v429_v19  }
  0x83   :  { %v46_v21 = vpop.permute.xlu0 %45 }
  0x84   :  { %v56_v22 = vpop.permute.xlu1 %55 }
  0x87   :  { %v51_v23 = vpop.permute.xlu0 %50 }
  0x88   :  { %v61_v28 = vpop.permute.xlu1 %60 }
  0x8b   :  { %v180_v44 = vpop.permute.xlu0 %179 }
  0x8c   :  { %v185_v43 = vpop.permute.xlu1 %184 }
  0x8f   :  { %v190_v51 = vpop.permute.xlu0 %189 }
  0x90   :  { %v195_v49 = vpop.permute.xlu1 %194 }
  0x93   :  { %v310_v3 = vpop.permute.xlu0 %309 }
  0x94   :  { %v315_v2 = vpop.permute.xlu1 %314 }
  0x97   :  { %v320_v10 = vpop.permute.xlu0 %319 }
  0x98   :  { %v325_v8 = vpop.permute.xlu1 %324 }
  0xd7   :  { %v561_v24 = vpop.f32.mrb[0].mxu0 }
  0xd8   :  { %v152_v25 = vadd.f32 %v561_v24, %v51_v23  ;;  %v146_v26 = vpop.f32.mrb[1].mxu0  ;;  %v433_v24 = vpop.permute.xlu0 %432 }
  0xd9   :  { %v147_v27 = vadd.f32 %v146_v26, %v46_v21  ;;  %v435_v21 = vlaneseq }
  0xda   :  { %632 = vtanh.f32 %v152_v25 }
  0xdb   :  { %634 = vtanh.f32 %v147_v27  ;;  %v564_v29 = vpop.f32.mrb[2].mxu0 }
  0xdc   :  { %v162_v30 = vadd.f32 %v564_v29, %v61_v28  ;;  %v156_v31 = vpop.f32.mrb[3].mxu0 }
  0xdd   :  { %v157_v32 = vadd.f32 %v156_v31, %v56_v22  ;;  %v436_v22 = vshrl.u32 %v435_v21, 7 }
  0xde   :  { %636 = vtanh.f32 %v162_v30 }
  0xdf   :  { %638 = vtanh.f32 %v157_v32  ;;  %v437_v23 = vsub.s32 0, %v436_v22 }
  0xe1   :  { %v438_v25 = vrot.slane %v433_v24, %v437_v23 }
  0xe4   :  { %v633_v33 = vpop.eup %632 }
  0xe5   :  { %v635_v34 = vpop.eup %634 }
  0xe6   :  { %v604_v35 = vpack.c.bf16 %v633_v33, %v635_v34 }
  0xe8   :  { %v637_v36 = vpop.eup %636  ;;  %605 = vmatprep.subr.bf16.mxu1 %v604_v35 }
  0xe9   :  { %v639_v37 = vpop.eup %638  ;;  %607 = vmatpush3.bf16.msra.mxu1 %v604_v35 }
  0xea   :  { %v608_v38 = vpack.c.bf16 %v637_v36, %v639_v37 }
  0xec   :  { %609 = vmatprep.subr.bf16.mxu1 %v608_v38 }
  0xed   :  { %611 = vmatpush3.bf16.msra.mxu1 %v608_v38 }
  0xee   :  { %620 = vmatprep.subr.bf16.mxu1 %v657_v0 }
  0xf0   :  { %574 = vmatmul.mubr.msk.f32.vlgmr.msra.gmra.mrb[0].mxu1 %vm197_vm2, %v170_v39 }
  0xf1   :  { %576 = vmatprep.mubr.msk.f32.mxu1 %vm197_vm2, %v171_v40 }
  0xf4   :  { %577 = vmatmul.mubr.msk.f32.gmra.mrb[2].mxu1 %vm197_vm2, %v172_v41 }
  0xf5   :  { %601 = vmatprep.mubr.msk.f32.mxu1 %vm658_vm3, %v659_v1 }
 0x1c3   :  { %v575_v45 = vpop.f32.mrb[0].mxu1 }
 0x1c4   :  { %v282_v46 = vadd.f32 %v575_v45, %v185_v43  ;;  %v276_v47 = vpop.f32.mrb[1].mxu1 }
 0x1c5   :  { %v277_v48 = vadd.f32 %v276_v47, %v180_v44 }
 0x1c6   :  { %640 = vtanh.f32 %v282_v46 }
 0x1c7   :  { %642 = vtanh.f32 %v277_v48  ;;  %v578_v50 = vpop.f32.mrb[2].mxu1 }
 0x1c8   :  { %v292_v52 = vadd.f32 %v578_v50, %v195_v49  ;;  %v286_v53 = vpop.f32.mrb[3].mxu1 }
 0x1c9   :  { %v287_v54 = vadd.f32 %v286_v53, %v190_v51 }
 0x1ca   :  { %644 = vtanh.f32 %v292_v52 }
 0x1cb   :  { %646 = vtanh.f32 %v287_v54 }
 0x1d0   :  { %v641_v55 = vpop.eup %640 }
 0x1d1   :  { %v643_v56 = vpop.eup %642 }
 0x1d2   :  { %v612_v57 = vpack.c.bf16 %v641_v55, %v643_v56 }
 0x1d4   :  { %v645_v58 = vpop.eup %644  ;;  %613 = vmatprep.subr.bf16.mxu0 %v612_v57 }
 0x1d5   :  { %v647_v59 = vpop.eup %646  ;;  %615 = vmatpush3.bf16.msra.mxu0 %v612_v57 }
 0x1d6   :  { %v616_v60 = vpack.c.bf16 %v645_v58, %v647_v59 }
 0x1d8   :  { %617 = vmatprep.subr.bf16.mxu0 %v616_v60 }
 0x1d9   :  { %619 = vmatpush3.bf16.msra.mxu0 %v616_v60 }
 0x1dc   :  { %588 = vmatmul.mubr.msk.f32.vlgmr.msra.gmra.mrb[4].mxu0 %vm197_vm2, %v300_v61 }
 0x1dd   :  { %590 = vmatprep.mubr.msk.f32.mxu0 %vm197_vm2, %v301_v62 }
 0x1e0   :  { %591 = vmatmul.mubr.msk.f32.gmra.mrb[6].mxu0 %vm197_vm2, %v302_v63 }
 0x2af   :  { %v589_v4 = vpop.f32.mrb[4].mxu0 }
 0x2b0   :  { %v411_v5 = vadd.f32 %v589_v4, %v315_v2  ;;  %v405_v6 = vpop.f32.mrb[5].mxu0 }
 0x2b1   :  { %v406_v7 = vadd.f32 %v405_v6, %v310_v3 }
 0x2b2   :  { %648 = vtanh.f32 %v411_v5 }
 0x2b3   :  { %650 = vtanh.f32 %v406_v7  ;;  %v592_v9 = vpop.f32.mrb[6].mxu0 }
 0x2b4   :  { %v421_v11 = vadd.f32 %v592_v9, %v325_v8  ;;  %v415_v12 = vpop.f32.mrb[7].mxu0 }
 0x2b5   :  { %v416_v13 = vadd.f32 %v415_v12, %v320_v10 }
 0x2b6   :  { %652 = vtanh.f32 %v421_v11 }
 0x2b7   :  { %654 = vtanh.f32 %v416_v13 }
 0x2bc   :  { %v649_v14 = vpop.eup %648 }
 0x2bd   :  { %v651_v15 = vpop.eup %650 }
 0x2be   :  { %v621_v16 = vpack.c.bf16 %v649_v14, %v651_v15 }
 0x2c0   :  { %v653_v17 = vpop.eup %652  ;;  %622 = vmatpush3.bf16.msra.mxu1 %v621_v16 }
 0x2c1   :  { %v655_v18 = vpop.eup %654  ;;  %623 = vmatprep.subr.bf16.mxu1 %v657_v0 }
 0x2c2   :  { %v624_v19 = vpack.c.bf16 %v653_v17, %v655_v18 }
 0x2c4   :  { %625 = vmatpush3.bf16.msra.mxu1 %v624_v19 }
 0x2c7   :  { %602 = vmatmul.mubr.msk.f32.vlgmr.msra.gmra.mrb[4].mxu1 %vm197_vm2, %v428_v20 }
 0x39a   :  { %v508_v26 = vpop.f32.mrb[4].mxu1 }
 0x39b   :  { %v509_v27 = vadd.f32 %v508_v26, %v438_v25  ;;  %v603_v28 = vpop.f32.mrb[5].mxu1 }
 0x39d   :  { %512 = vst [vmem:[%s818_s9] sm:$0x1] %v509_v27 }

</bundles_post_ra>
